<compile_context>
chip_gen: v7x
topology: tpu7x:2x2x1
jax: 0.10.0
libtpu: 0.0.40
codegen_flags: <defaults>
</compile_context>

<pallas_src>
import functools

import jax
import jax.numpy as jnp
from jax.experimental import pallas as pl
from jax.experimental.pallas import tpu as pltpu


def _round_up(x, m):
    return ((x + m - 1) // m) * m


def _cdiv(a, b):
    return -(-a // b)


def _degree_embed_kernel(codes_ref, sel_ref, band_ref, table_ref, o_ref, *, vocab):
    """One grid step handles TR grouped rows (= TR * G original nodes).

    codes_ref : [TR, 2G] int32  raw degrees; column c = 2g + is_out holds the
                                in-degree (c even) / out-degree (c odd) of sub-row g
    sel_ref   : [2G, K]  f32    band-selection matrix, sel[c, j] = (j // V == c)
    band_ref  : [1, K]   f32    per-column in-band position, band[0, j] = j % V
    table_ref : [K, Dg]  f32    block-diagonal fused table (K = 2*V*G, Dg = G*D;
                                diagonal block g holds [E_in ; E_out])
    o_ref     : [TR, Dg] f32    lane-dense output slab
    """
    # clamp(degree, 0, max_degree) -- matches torch.clamp in DegreeEncoder.
    deg = jnp.clip(codes_ref[...], 0, vocab - 1).astype(jnp.float32)          # [TR, 2G]

    # Single-pass multi-hot construction:
    #   expanded[r, j] = deg[r, j // V]   (one tiny MXU matmul, contraction = 2G)
    #   onehot[r, j]   = (expanded[r, j] == j % V)   (one full-width compare)
    # Exactly 2G hot entries per row -> one gather-matmul sums both embeddings
    # for all G packed nodes at once.
    expanded = jnp.dot(deg, sel_ref[...], preferred_element_type=jnp.float32)  # [TR, K]
    onehot = (jnp.abs(expanded - band_ref[...]) < 0.5).astype(jnp.float32)     # [TR, K]

    # One MXU gather-matmul against the block-diagonal fused table produces the
    # result directly in the lane-dense [TR, G*D] layout (unmasked full-width vst).
    emb = jnp.dot(onehot, table_ref[...], preferred_element_type=jnp.float32)
    o_ref[...] = emb.astype(o_ref.dtype)


def prepare_degree_tables(table_in, table_out, *, max_table_bytes=8 * 1024 * 1024):
    """Per-parameter-update preparation, hoisted out of the per-forward path.

    Builds:
      * G        : lane-packing factor (G consecutive nodes per 128-wide output row)
      * t_bd     : block-diagonal fused table [2*V*G, G*D], block g = [E_in ; E_out]
      * sel      : band-selection matrix [2G, 2*V*G]
      * band_pos : in-band position row  [1, 2*V*G]  (j % V as f32)
    The block-diagonal trick costs G^2 x table memory, so G is shrunk when the
    degree vocabulary is large (scalability guard).
    """
    V, D = table_in.shape
    G = 128 // D if (D < 128 and 128 % D == 0) else 1
    while G > 1 and (2 * V * G) * (G * D) * 4 > max_table_bytes:
        G //= 2

    t_fused = jnp.concatenate(
        [table_in.astype(jnp.float32), table_out.astype(jnp.float32)], axis=0)    # [2V, D]
    t_bd = jnp.kron(jnp.eye(G, dtype=jnp.float32), t_fused)                       # [2VG, GD]

    K = 2 * V * G
    sel = (jnp.arange(K, dtype=jnp.int32) // V
           == jnp.arange(2 * G, dtype=jnp.int32)[:, None]).astype(jnp.float32)    # [2G, K]
    band_pos = (jnp.arange(K, dtype=jnp.int32) % V).astype(jnp.float32).reshape(1, K)
    return t_bd, sel, band_pos, G


def degree_encoder_both(in_degree, out_degree, table_in, table_out, *,
                        tile_rows=2048, prepared=None):
    """Pallas equivalent of DegreeEncoder(direction='both') forward.

    in_degree, out_degree : [B, N] integer (pad_sequence output, batch_first, pad=0)
    table_in, table_out   : [max_degree + 1, D] float32 embedding tables
    prepared              : optional prepare_degree_tables() result (cache it across
                            forwards; rebuilding the fused table per call is wasted
                            HBM traffic for large vocabularies)
    returns               : [B, N, D] float32
    """
    B, N = in_degree.shape
    V, D = table_in.shape
    M = B * N

    if prepared is None:
        prepared = prepare_degree_tables(table_in, table_out)
    t_bd, sel, band_pos, G = prepared
    Dg = G * D                      # output row width (128 when D divides 128)
    K = 2 * V * G                   # fused block-diagonal table rows

    R_needed = _cdiv(M, G)          # grouped output rows actually needed

    # ---- tile sizing (VMEM-budget driven; safe on v7x's 64 MiB/TC VMEM) -----
    bytes_per_row = 4 * (2 * Dg            # double-buffered output block
                         + 2 * (2 * G)     # double-buffered codes block (int32)
                         + 3 * K)          # onehot / expanded intermediates
    fixed_bytes = 4 * (2 * K * Dg + 2 * (2 * G) * K + 2 * K)   # table + sel + band (buffered)
    budget = 40 * 1024 * 1024
    tr_budget = max(8, (budget - fixed_bytes) // bytes_per_row)

    TR = max(8, min(int(tile_rows), int(tr_budget)))
    # Keep >= 2 grid steps when there is enough work so the ("parallel",) grid
    # axis shards across v7x's two TensorCores (free ~2x there; harmless elsewhere).
    TR = min(TR, max(8, _round_up(_cdiv(R_needed, 2), 8)))
    TR = _round_up(TR, 8)
    TR = min(TR, _round_up(R_needed, 8))

    R = _round_up(R_needed, TR)
    M_pad = R * G
    grid = R // TR

    # VMEM limit = actual need + generous headroom (no blanket 32 MiB clamp).
    need = fixed_bytes + TR * bytes_per_row
    vmem_limit = int(min(max(2 * need, 16 * 1024 * 1024), 48 * 1024 * 1024))

    # ---- inputs --------------------------------------------------------------
    in_flat = in_degree.reshape(-1).astype(jnp.int32)
    out_flat = out_degree.reshape(-1).astype(jnp.int32)
    if M_pad != M:
        in_flat = jnp.pad(in_flat, (0, M_pad - M))    # pad value 0 -> rows sliced off
        out_flat = jnp.pad(out_flat, (0, M_pad - M))

    # Fused int input [R, 2G]: column 2g = in-degree, 2g+1 = out-degree of sub-row g.
    codes = jnp.stack([in_flat, out_flat], axis=-1).reshape(R, 2 * G)

    out = pl.pallas_call(
        functools.partial(_degree_embed_kernel, vocab=V),
        out_shape=jax.ShapeDtypeStruct((R, Dg), jnp.float32),
        grid_spec=pltpu.PrefetchScalarGridSpec(
            num_scalar_prefetch=0,
            grid=(grid,),
            in_specs=[
                pl.BlockSpec((TR, 2 * G), lambda i: (i, 0)),   # fused degrees
                pl.BlockSpec((2 * G, K), lambda i: (0, 0)),    # band-selection matrix
                pl.BlockSpec((1, K), lambda i: (0, 0)),        # in-band positions (j % V)
                pl.BlockSpec((K, Dg), lambda i: (0, 0)),       # fused table, resident
            ],
            out_specs=pl.BlockSpec((TR, Dg), lambda i: (i, 0)),
        ),
        compiler_params=pltpu.CompilerParams(
            dimension_semantics=("parallel",),
            vmem_limit_bytes=vmem_limit,
        ),
    )(codes, sel, band_pos, t_bd)

    # Un-group the lane-dense slab back to [B, N, D] and drop padding rows.
    return out.reshape(M_pad, D)[:M].reshape(B, N, D)


def _reference(in_degree, out_degree, table_in, table_out):
    """Plain-JAX reference matching the PyTorch DegreeEncoder('both') semantics."""
    V = table_in.shape[0]
    d_in = jnp.clip(in_degree, 0, V - 1)
    d_out = jnp.clip(out_degree, 0, V - 1)
    return jnp.take(table_in, d_in, axis=0) + jnp.take(table_out, d_out, axis=0)


if __name__ == "__main__":
    # TODO(synk): DGL unbatch() / pad_sequence() is host-side graph plumbing with
    # no tensor math; the kernel consumes the already-padded degree tensors.
    B, N = 2, 16
    max_degree = 7
    embedding_dim = 32
    V = max_degree + 1

    key = jax.random.PRNGKey(0)
    k_in, k_out, k_din, k_dout = jax.random.split(key, 4)

    # nn.Embedding ~ N(0,1); padding_idx=0 -> row 0 zeroed.
    table_in = jax.random.normal(k_in, (V, embedding_dim), dtype=jnp.float32)
    table_out = jax.random.normal(k_out, (V, embedding_dim), dtype=jnp.float32)
    table_in = table_in.at[0].set(0.0)
    table_out = table_out.at[0].set(0.0)

    # Synthetic padded degree tensors (pad_sequence pads with 0).  Include degrees
    # above max_degree to exercise the clamp; graph 1 has only 10 nodes -> padded.
    in_degree = jax.random.randint(k_din, (B, N), 0, max_degree + 4, dtype=jnp.int32)
    out_degree = jax.random.randint(k_dout, (B, N), 0, max_degree + 4, dtype=jnp.int32)
    in_degree = in_degree.at[1, 10:].set(0)
    out_degree = out_degree.at[1, 10:].set(0)

    # Hoisted per-parameter preparation (built once, reused every forward).
    prepared = prepare_degree_tables(table_in, table_out)

    emb = degree_encoder_both(in_degree, out_degree, table_in, table_out,
                              prepared=prepared)
    emb = jax.block_until_ready(emb)

    ref = _reference(in_degree, out_degree, table_in, table_out)
    assert emb.shape == (B, N, embedding_dim)
    assert jnp.allclose(emb, ref, atol=1e-5, rtol=1e-5), "Pallas kernel mismatch vs reference"

    print("KERNEL_OK")
</pallas_src>

<mosaic_0001>
module attributes {stable_mosaic.version = 11 : i64} {
  func.func @_degree_embed_kernel(%arg0: i32, %arg1: memref<8x8xi32, #tpu.memory_space<vmem>>, %arg2: memref<8x64xf32, #tpu.memory_space<vmem>>, %arg3: memref<1x64xf32, #tpu.memory_space<vmem>>, %arg4: memref<64x128xf32, #tpu.memory_space<vmem>>, %arg5: memref<8x128xf32, #tpu.memory_space<vmem>>) attributes {dimension_semantics = [#tpu.dimension_semantics<parallel>], iteration_bounds = array<i64: 1>, scalar_prefetch = 0 : i64, scratch_operands = 0 : i64, tpu.core_type = #tpu.core_type<tc>, window_params = [{transform_indices = @transform_0, window_bounds = array<i64: 8, 8>}, {pipeline_mode = #tpu.pipeline_mode<synchronous>, transform_indices = @transform_1, window_bounds = array<i64: 8, 64>}, {pipeline_mode = #tpu.pipeline_mode<synchronous>, transform_indices = @transform_2, window_bounds = array<i64: 1, 64>}, {pipeline_mode = #tpu.pipeline_mode<synchronous>, transform_indices = @transform_3, window_bounds = array<i64: 64, 128>}, {transform_indices = @transform_4, window_bounds = array<i64: 8, 128>}]} {
    %c0 = arith.constant 0 : index
    %c0_0 = arith.constant 0 : index
    %0 = vector.load %arg1[%c0, %c0_0] : memref<8x8xi32, #tpu.memory_space<vmem>>, vector<8x8xi32>
    %c0_i32 = arith.constant 0 : i32
    %c7_i32 = arith.constant 7 : i32
    %1 = vector.broadcast %c0_i32 : i32 to vector<8x8xi32>
    %2 = arith.maxsi %1, %0 : vector<8x8xi32>
    %3 = vector.broadcast %c7_i32 : i32 to vector<8x8xi32>
    %4 = arith.minsi %3, %2 : vector<8x8xi32>
    %5 = arith.sitofp %4 : vector<8x8xi32> to vector<8x8xf32>
    %c0_1 = arith.constant 0 : index
    %c0_2 = arith.constant 0 : index
    %6 = vector.load %arg2[%c0_1, %c0_2] : memref<8x64xf32, #tpu.memory_space<vmem>>, vector<8x64xf32>
    %cst = arith.constant dense<0.000000e+00> : vector<8x64xf32>
    %7 = tpu.matmul %5, %6, %cst {dimension_numbers = #tpu.dot_dimension_numbers<[1], [0], [0], [1], [0, 0, 1, 1], [], []>} : vector<8x8xf32>, vector<8x64xf32>, vector<8x64xf32> -> vector<8x64xf32>
    %c0_3 = arith.constant 0 : index
    %c0_4 = arith.constant 0 : index
    %8 = vector.load %arg3[%c0_3, %c0_4] : memref<1x64xf32, #tpu.memory_space<vmem>>, vector<1x64xf32>
    %9 = vector.broadcast %8 : vector<1x64xf32> to vector<8x64xf32>
    %10 = arith.subf %7, %9 : vector<8x64xf32>
    %11 = math.absf %10 : vector<8x64xf32>
    %cst_5 = arith.constant 5.000000e-01 : f32
    %12 = vector.broadcast %cst_5 : f32 to vector<8x64xf32>
    %13 = arith.cmpf olt, %11, %12 : vector<8x64xf32>
    %14 = arith.extui %13 : vector<8x64xi1> to vector<8x64xi32>
    %15 = arith.sitofp %14 : vector<8x64xi32> to vector<8x64xf32>
    %c0_6 = arith.constant 0 : index
    %c0_7 = arith.constant 0 : index
    %16 = vector.load %arg4[%c0_6, %c0_7] : memref<64x128xf32, #tpu.memory_space<vmem>>, vector<64x128xf32>
    %cst_8 = arith.constant dense<0.000000e+00> : vector<8x128xf32>
    %17 = tpu.matmul %15, %16, %cst_8 {dimension_numbers = #tpu.dot_dimension_numbers<[1], [0], [0], [1], [0, 0, 1, 1], [], []>} : vector<8x64xf32>, vector<64x128xf32>, vector<8x128xf32> -> vector<8x128xf32>
    %c0_9 = arith.constant 0 : index
    %c0_10 = arith.constant 0 : index
    %18 = vector.load %arg5[%c0_9, %c0_10] : memref<8x128xf32, #tpu.memory_space<vmem>>, vector<8x128xf32>
    tpu.vector_store %arg5[%c0_9, %c0_10], %17 {strides = array<i32>} : memref<8x128xf32, #tpu.memory_space<vmem>>, vector<8x128xf32>,
    return
  }
  func.func @transform_0(%arg0: i32) -> (i32, i32) {
    %c0_i32 = arith.constant 0 : i32
    %c0_i32_0 = arith.constant 0 : i32
    return %arg0, %c0_i32 : i32, i32
  }
  func.func @transform_1(%arg0: i32) -> (i32, i32) {
    %c0_i32 = arith.constant 0 : i32
    %c0_i32_0 = arith.constant 0 : i32
    %c0_i32_1 = arith.constant 0 : i32
    return %c0_i32, %c0_i32_0 : i32, i32
  }
  func.func @transform_2(%arg0: i32) -> (i32, i32) {
    %c0_i32 = arith.constant 0 : i32
    %c0_i32_0 = arith.constant 0 : i32
    %c0_i32_1 = arith.constant 0 : i32
    return %c0_i32, %c0_i32_0 : i32, i32
  }
  func.func @transform_3(%arg0: i32) -> (i32, i32) {
    %c0_i32 = arith.constant 0 : i32
    %c0_i32_0 = arith.constant 0 : i32
    %c0_i32_1 = arith.constant 0 : i32
    return %c0_i32, %c0_i32_0 : i32, i32
  }
  func.func @transform_4(%arg0: i32) -> (i32, i32) {
    %c0_i32 = arith.constant 0 : i32
    %c0_i32_0 = arith.constant 0 : i32
    return %arg0, %c0_i32 : i32, i32
  }
}

</mosaic_0001>

<bundles_post_ra>
// kernel: tpu_custom_call.1
= control target key start
LH: loop header
LB: loop body
LE: loop exit
PB: predicated region body
PF: predicated region fallthrough
CT: control target
= control target key end

     0   :  { %9 = vsyncpa [#allocation3], 0  ;;  %s486_s0 = inlined_call_operand.hbm [shape: s32[8,8], index: 0, kind: input, shape index: {}]   ;;  %s487_s1 = inlined_call_operand.hbm [shape: f32[8,64], index: 1, kind: input, shape index: {}]   ;;  %s488_s2 = inlined_call_operand.vmem [shape: f32[1,64], index: 2, kind: input, shape index: {}]   ;;  %s489_s3 = inlined_call_operand.hbm [shape: f32[64,128], index: 3, kind: input, shape index: {}]   ;;  %s490_s4 = inlined_call_operand.hbm [shape: f32[8,128], index: 4, kind: output, shape index: {}]  }
   0x1   :  { %10 = vsyncpa [#allocation6], 0 }
   0x2   :  { %11 = vsyncpa [#allocation4], 0  ;;  %s401_s15 = smov [#allocation5]   ;;  %s402_s17 = smov [#allocation2]  }
   0x3   :  { %s28_s16 = sshll.u32 %s401_s15, 4  ;;  %s18_s18 = sshll.u32 %s402_s17, 4  ;;  %s29_s16 = int_to_ptr.vmem [resolvable:$true] %s28_s16  ;;  %s19_s18 = int_to_ptr.vmem [resolvable:$true] %s18_s18 }
   0x4   :  { %s307_s21 = scalar_lea.hbm %s487_s1, 128 }
   0x5   :  { %p308_p0 = scmp.ne.s32.totalorder %s487_s1, %s307_s21  ;;  %p311_p1 = scmp.lt.u32.totalorder %s307_s21, %s487_s1 }
   0x7   :  { %p313_p2 = pnand %p311_p1, %p308_p0 }
   0x9   :  { %316 = shalt.err (!%p313_p2)
}
   0xa   :  { %s317_s26 = scalar_lea.vmem %s29_s16, 128  ;;  %p322_p4 = scmp.lt.s32.totalorder %s29_s16, %s29_s16 }
   0xb   :  { %p318_p3 = scmp.ne.s32.totalorder %s29_s16, %s317_s26  ;;  %p323_p5 = scmp.lt.s32.totalorder %s317_s26, %s317_s26 }
   0xd   :  { %p324_p6 = por %p323_p5, %p322_p4 }
   0xf   :  { %p325_p7 = pnand %p324_p6, %p318_p3 }
  0x11   :  { %328 = shalt.err (!%p325_p7)
}
  0x12   :  { %31 = dma.hbm_to_vmem [thread:$0]  %s487_s1, 128, %s29_s16, [#allocation6]  }
  0x13   :  { %s329_s5 = scalar_lea.hbm %s486_s0, 128 }
  0x14   :  { %p330_p8 = scmp.ne.s32.totalorder %s486_s0, %s329_s5  ;;  %p333_p9 = scmp.lt.u32.totalorder %s329_s5, %s486_s0 }
  0x16   :  { %p335_p10 = pnand %p333_p9, %p330_p8 }
  0x18   :  { %338 = shalt.err (!%p335_p10)
}
  0x19   :  { %s339_s10 = scalar_lea.vmem %s19_s18, 128  ;;  %p344_p12 = scmp.lt.s32.totalorder %s19_s18, %s19_s18 }
  0x1a   :  { %p340_p11 = scmp.ne.s32.totalorder %s19_s18, %s339_s10  ;;  %p345_p13 = scmp.lt.s32.totalorder %s339_s10, %s339_s10 }
  0x1c   :  { %p346_p0 = por %p345_p13, %p344_p12 }
  0x1e   :  { %p347_p1 = pnand %p346_p0, %p340_p11 }
  0x20   :  { %350 = shalt.err (!%p347_p1)
}
  0x21   :  { %21 = dma.hbm_to_vmem [thread:$0]  %s486_s0, 128, %s19_s18, [#allocation3]  }
  0x22   :  { %s403_s12 = smov [#allocation7]   ;;  %s351_s16 = scalar_lea.hbm %s489_s3, 1024 }
  0x23   :  { %s39_s13 = sshll.u32 %s403_s12, 4  ;;  %p352_p2 = scmp.ne.s32.totalorder %s489_s3, %s351_s16  ;;  %s40_s13 = int_to_ptr.vmem [resolvable:$true] %s39_s13 }
  0x24   :  { %p355_p3 = scmp.lt.u32.totalorder %s351_s16, %s489_s3 }
  0x26   :  { %p357_p4 = pnand %p355_p3, %p352_p2 }
  0x28   :  { %360 = shalt.err (!%p357_p4)
}
  0x29   :  { %s361_s22 = scalar_lea.vmem %s40_s13, 1024  ;;  %p366_p6 = scmp.lt.s32.totalorder %s40_s13, %s40_s13 }
  0x2a   :  { %p362_p5 = scmp.ne.s32.totalorder %s40_s13, %s361_s22  ;;  %p367_p7 = scmp.lt.s32.totalorder %s361_s22, %s361_s22 }
  0x2c   :  { %p368_p8 = por %p367_p7, %p366_p6 }
  0x2e   :  { %p369_p9 = pnand %p368_p8, %p362_p5 }
  0x30   :  { %372 = shalt.err (!%p369_p9)
}
  0x31   :  { %s404_s0 = smov 128   ;;  %s405_s18 = smov 8  }
  0x32   :  { %45 = dma.hbm_to_vmem [thread:$0]  %s489_s3, 1024, %s40_s13, [#allocation6], %s404_s0, %s404_s0, %s405_s18  }
  0x33   :  { %395 = dma.done.wait [#allocation3], 128  }
  0x34   :  { %396 = vsyncadd [#allocation3], 4294967168 }
  0x35   :  { %397 = dma.done.wait [#allocation6], 1152  }
  0x36   :  { %398 = vsyncadd [#allocation6], 4294966144  ;;  %v406_v0 = vmov 0.0   ;;  %vm407_vm0 = vmmov 0   ;;  %v408_v1 = vmov 0.0|0.0   ;;  %v61_v2 = vld [vmem:[#allocation5] sm:$0xff] }
  0x37   :  { %262 = vmatprep.subr.mxu0 %v406_v0  ;;  %264 = vmatprep.mubr.msk.f32.mxu0 %vm407_vm0, %v406_v0  ;;  %v55_v3 = vld [vmem:[#allocation2] sm:$0xff]  ;;  %v148_v4 = vld [vmem:[#allocation7] sm:$0xff]  ;;  %v149_v5 = vld [vmem:[#allocation7 + $0x8] sm:$0xff]  ;;  %vm62_vm3 = vcmask 64512   ;;  %vm156_vm4 = vcmask 523264   ;;  %s409_s26 = smov [#allocation8]  }
  0x38   :  { %286 = vmatprep.subr.bf16.mxu1 %v408_v1  ;;  %283 = vmatprep.mubr.msk.f32.mxu1 %vm407_vm0, %v406_v0  ;;  %vm56_vm1 = vcmp.gt.s32.totalorder %v55_v3, 0  ;;  %v150_v6 = vld [vmem:[#allocation7 + $0x10] sm:$0xff]  ;;  %v151_v7 = vld [vmem:[#allocation7 + $0x18] sm:$0xff]  ;;  %v287_v9 = vpack.c.bf16 %v149_v5, %v148_v4  ;;  %v152_v13 = vld [vmem:[#allocation7 + $0x20] sm:$0xff]  ;;  %s237_s27 = sshll.u32 %s409_s26, 4  ;;  %s238_s27 = int_to_ptr.vmem [resolvable:$true] %s237_s27 }
  0x39   :  { %263 = vmatpush3.msra.mxu0 %v61_v2  ;;  %v57_v8 = vsel %vm56_vm1, %v55_v3, 0  ;;  %v290_v11 = vpack.c.bf16 %v151_v7, %v150_v6  ;;  %v153_v14 = vld [vmem:[#allocation7 + $0x28] sm:$0xff]  ;;  %v154_v16 = vld [vmem:[#allocation7 + $0x30] sm:$0xff]  ;;  %v155_v17 = vld [vmem:[#allocation7 + $0x38] sm:$0xff]  ;;  %s373_s28 = scalar_lea.vmem %s238_s27, 128  ;;  %p378_p11 = scmp.lt.s32.totalorder %s238_s27, %s238_s27 }
  0x3a   :  { %vm58_vm2 = vcmp.lt.s32.totalorder %v57_v8, 7  ;;  %288 = vmatpush3.bf16.msra.mxu1 %v287_v9  ;;  %v293_v15 = vpack.c.bf16 %v153_v14, %v152_v13  ;;  %v296_v18 = vpack.c.bf16 %v155_v17, %v154_v16  ;;  %v248_v19 = vld [vmem:[%s488_s2] ss:$0 sm:$0xff]  ;;  %p374_p10 = scmp.ne.s32.totalorder %s238_s27, %s373_s28  ;;  %p379_p12 = scmp.lt.s32.totalorder %s373_s28, %s373_s28 }
  0x3b   :  { %v59_v10 = vsel %vm58_vm2, %v57_v8, 7  ;;  %289 = vmatprep.subr.bf16.mxu1 %v408_v1 }
  0x3c   :  { %v60_v12 = vcvt.s32.f32 %v59_v10  ;;  %p380_p13 = por %p379_p12, %p378_p11 }
  0x3e   :  { %265 = vmatmul.mubr.msk.f32.vlgmr.msra.gmra.mrb[0].mxu0 %vm62_vm3, %v60_v12  ;;  %291 = vmatpush3.bf16.msra.mxu1 %v290_v11  ;;  %p381_p0 = pnand %p380_p13, %p374_p10 }
  0x3f   :  { %292 = vmatprep.subr.bf16.mxu1 %v408_v1 }
  0x42   :  { %294 = vmatpush3.bf16.msra.mxu1 %v293_v15 }
  0x43   :  { %295 = vmatprep.subr.bf16.mxu1 %v408_v1 }
  0x46   :  { %297 = vmatpush3.bf16.msra.mxu1 %v296_v18 }
 0x111   :  { %v132_v20 = vpop.f32.mrb[0].mxu0 }
 0x112   :  { %v143_v21 = vsub.f32 %v132_v20, %v248_v19  ;;  %v266_v22 = vpop.f32.mrb[1].mxu0 }
 0x114   :  { %v144_v23 = vand.u32 2147483647, %v143_v21 }
 0x116   :  { %vm145_vm5 = vcmp.lt.f32.partialorder %v144_v23, 0.5 }
 0x117   :  { %v249_v24 = vsel %vm145_vm5, 1.0, %v406_v0 }
 0x118   :  { %284 = vmatmul.mubr.msk.f32.vlgmr.msra.gmra.mrb[0].mxu1 %vm156_vm4, %v249_v24 }
 0x1eb   :  { %v226_v25 = vpop.f32.mrb[0].mxu1 }
 0x1ec   :  { %230 = vst [vmem:[#allocation8] sm:$0xff] %v226_v25  ;;  %v285_v26 = vpop.f32.mrb[1].mxu1 }
 0x1ed   :  { %384 = shalt.err (!%p381_p0)
}
 0x1ee   :  { %s385_s30 = scalar_lea.hbm %s490_s4, 128 }
 0x1ef   :  { %p386_p1 = scmp.ne.s32.totalorder %s490_s4, %s385_s30  ;;  %p389_p2 = scmp.lt.u32.totalorder %s385_s30, %s490_s4 }
 0x1f1   :  { %p391_p3 = pnand %p389_p2, %p386_p1 }
 0x1f3   :  { %394 = shalt.err (!%p391_p3)
}
 0x1f4   :  { %240 = dma.vmem_to_hbm [thread:$0]  %s238_s27, 128, %s490_s4, [#allocation4]  }
 0x1f5   :  { %399 = dma.done.wait [#allocation4], 128  }
 0x1f6   :  { %400 = vsyncadd [#allocation4], 4294967168 }
 0x1f7   :  { %244 = vsyncpa [#allocation3], 1 }
 0x1f8   :  { %245 = vsyncpa [#allocation6], 1 }
 0x1f9   :  { %246 = vsyncpa [#allocation4], 1 }

</bundles_post_ra>
